<compile_context>
chip_gen: v7x
topology: tpu7x:2x2x1
jax: 0.10.0
libtpu: 0.0.40
codegen_flags: <defaults>
</compile_context>

<pallas_src>
import numpy as np
import jax
import jax.numpy as jnp
from jax.experimental import pallas as pl
from jax.experimental.pallas import tpu as pltpu


def _round_up(x, m):
    return ((x + m - 1) // m) * m


def _choose_tile_t(T, C, itemsize):
    # Keep each scores block ~<= 4 MiB so that 2 inputs x 2 double-buffers plus
    # scratch stay comfortably inside scoped VMEM even on v7x (64 MiB physical).
    budget_bytes = 4 * 1024 * 1024
    rows = budget_bytes // max(1, C * itemsize)
    rows = max(8, (rows // 8) * 8)      # f32 sublane multiple
    rows = min(rows, 512)               # ~85% of HBM roofline already at 512
    return int(min(rows, _round_up(T, 8)))


# ---------------------------------------------------------------------------
# Kernel 1: target-class log-prob per packed timestep (tiled over T).
# ---------------------------------------------------------------------------
def _logp_gather_kernel(scores_ref, target_ref, out_ref):
    s = scores_ref[...].astype(jnp.float32)                   # (TILE_T, C)
    tgt = target_ref[...]                                     # (TILE_T, 1) int32
    m = jnp.max(s, axis=1, keepdims=True)                     # (TILE_T, 1)
    lse = jnp.log(jnp.sum(jnp.exp(s - m), axis=1, keepdims=True))
    c_iota = jax.lax.broadcasted_iota(jnp.int32, s.shape, 1)
    # gather the target logit directly; log_softmax[t, tgt] = s_tgt - m - lse
    tgt_logit = jnp.sum(jnp.where(c_iota == tgt, s, 0.0), axis=1, keepdims=True)
    out_ref[...] = tgt_logit - m - lse                        # (TILE_T, 1)


def packed_target_logprob(packed_data, targets):
    """packed_data: (T, C) native dtype; targets: (T,) int -> (T,) f32 log-probs."""
    T, C = packed_data.shape
    itemsize = jnp.dtype(packed_data.dtype).itemsize
    tile_t = _choose_tile_t(T, C, itemsize)
    T_pad = _round_up(T, tile_t)

    scores = packed_data                     # no wrapper-side dtype cast
    tgt = targets.reshape(T, 1).astype(jnp.int32)
    if T_pad != T:
        scores = jnp.pad(scores, ((0, T_pad - T), (0, 0)))
        tgt = jnp.pad(tgt, ((0, T_pad - T), (0, 0)))

    out = pl.pallas_call(
        _logp_gather_kernel,
        out_shape=jax.ShapeDtypeStruct((T_pad, 1), jnp.float32),
        grid=(T_pad // tile_t,),
        in_specs=[
            pl.BlockSpec((tile_t, C), lambda i: (i, 0)),
            pl.BlockSpec((tile_t, 1), lambda i: (i, 0)),
        ],
        out_specs=pl.BlockSpec((tile_t, 1), lambda i: (i, 0)),
        compiler_params=pltpu.CompilerParams(
            dimension_semantics=("parallel",)),   # shards across 2 TCs on v7x
    )(scores, tgt)
    return out[:T, 0]


# ---------------------------------------------------------------------------
# Kernel 2: per-sequence re-weighting softmax + weighted reduction (tiled over B,
# accumulator output resident across the grid).
# ---------------------------------------------------------------------------
def _seq_weight_kernel(result_ref, len_ref, out_ref):
    @pl.when(pl.program_id(0) == 0)
    def _():
        out_ref[...] = jnp.zeros_like(out_ref)

    res = result_ref[...]                                     # (TILE_B, L) f32
    lens = len_ref[...]                                       # (TILE_B, 1) int32
    tb, L = res.shape
    j = jax.lax.broadcasted_iota(jnp.int32, (tb, L), 1)
    valid = j < lens                                          # j < L_i

    # prop_log[i, 0] = 0 ; prop_log[i, j] = res[i, j-1]   (shift right by one)
    zeros_col = jnp.zeros((tb, 1), dtype=jnp.float32)
    prop_log = jnp.concatenate([zeros_col, res[:, : L - 1]], axis=1)
    prop = jnp.exp(prop_log)                                  # in (0, 1] on valid

    # prop <= 1 so a constant shift of 1.0 stabilizes the softmax exp --
    # no cross-lane row-max (XLU) reduction needed.
    e = jnp.where(valid, jnp.exp(prop - 1.0), 0.0)
    denom = jnp.sum(e, axis=1, keepdims=True)
    denom = jnp.where(denom > 0.0, denom, 1.0)                # guard zero-length pad rows
    inv = pl.reciprocal(denom, approx=True)
    w = lens.astype(jnp.float32) * e * inv                    # softmax * L_i

    contrib = jnp.where(valid, res * w, 0.0)
    out_ref[...] += jnp.sum(jnp.sum(contrib, axis=1, keepdims=True),
                            axis=0, keepdims=True)            # (1, 1)


def seq_weighted_sum(result_pad, lengths):
    """result_pad: (B, L_max) f32; lengths: (B,) int -> scalar sum."""
    B, L = result_pad.shape
    TILE_B = 8
    B_pad = _round_up(B, TILE_B)

    res = result_pad
    lens = jnp.asarray(np.asarray(lengths), dtype=jnp.int32).reshape(B, 1)
    if B_pad != B:
        res = jnp.pad(res, ((0, B_pad - B), (0, 0)))
        lens = jnp.pad(lens, ((0, B_pad - B), (0, 0)))        # padded rows: length 0

    out = pl.pallas_call(
        _seq_weight_kernel,
        out_shape=jax.ShapeDtypeStruct((1, 1), jnp.float32),
        grid=(B_pad // TILE_B,),
        in_specs=[
            pl.BlockSpec((TILE_B, L), lambda i: (i, 0)),
            pl.BlockSpec((TILE_B, 1), lambda i: (i, 0)),
        ],
        out_specs=pl.BlockSpec((1, 1), lambda i: (0, 0)),     # resident accumulator
        compiler_params=pltpu.CompilerParams(
            dimension_semantics=("arbitrary",)),
    )(res, lens)
    return out[0, 0]


# ---------------------------------------------------------------------------
# Glue: pack / unpack index plumbing (pad_packed_sequence equivalents),
# vectorized numpy (host / trace time only).
# ---------------------------------------------------------------------------
def pack_padded(padded, lengths):
    """padded: (B, L_max, C) np array, lengths sorted descending."""
    lengths = np.asarray(lengths)
    L_max = int(lengths[0])
    t = np.arange(L_max)
    batch_sizes = (lengths[None, :] > t[:, None]).sum(axis=1).astype(np.int32)
    time_idx = np.repeat(t, batch_sizes)
    starts = np.cumsum(batch_sizes) - batch_sizes
    seq_idx = np.arange(int(batch_sizes.sum())) - np.repeat(starts, batch_sizes)
    data = padded[seq_idx, time_idx]                          # (T, C)
    return data, batch_sizes


def cross_entropy_loss_mul(packed_data, targets, batch_sizes, lengths):
    """Forward pass of CrossEntropyLoss_mul."""
    T = packed_data.shape[0]
    lengths = np.asarray(lengths)
    batch_sizes = np.asarray(batch_sizes)
    assert np.all(lengths >= 1), "zero-length sequences are not supported"
    B = len(lengths)
    L_max = int(lengths.max())

    # kernel 1: target log-probs for every packed timestep
    result = packed_target_logprob(packed_data, targets)     # (T,) f32

    # pad_packed_sequence: static index tables (numpy) + one tiny XLA gather of
    # the (T,) result vector.
    # TODO(synk): fully fusing this scatter into kernel 1 needs per-row Element
    # gathers (packed rows of one sequence are not contiguous); left as glue.
    offsets = np.concatenate([[0], np.cumsum(batch_sizes[:-1])]).astype(np.int32)
    tt = np.arange(L_max)[None, :]
    ii = np.arange(B)[:, None]
    mask_np = tt < lengths[:, None]                           # (B, L_max)
    idx_np = np.where(mask_np, offsets[None, :] + ii, 0).astype(np.int32)
    result_pad = jnp.where(jnp.asarray(mask_np), result[jnp.asarray(idx_np)], 0.0)

    # kernel 2: per-sequence softmax re-weighting + weighted reduction
    total = seq_weighted_sum(result_pad, lengths)

    batch_size = T                                            # len(target) in torch
    return -total / jnp.float32(batch_size)


# ---------------------------------------------------------------------------
# Pure numpy reference (same math) for a correctness check.
# ---------------------------------------------------------------------------
def reference_loss(packed_data, targets, batch_sizes, lengths):
    s = packed_data.astype(np.float64)
    m = s.max(axis=1, keepdims=True)
    logsm = s - m - np.log(np.exp(s - m).sum(axis=1, keepdims=True))
    result = logsm[np.arange(len(targets)), targets]
    offsets = np.concatenate([[0], np.cumsum(batch_sizes)[:-1]])
    B = len(lengths)
    L_max = int(np.max(lengths))
    pad = np.zeros((B, L_max))
    for i in range(B):
        for t in range(int(lengths[i])):
            pad[i, t] = result[offsets[t] + i]
    total = 0.0
    for i in range(B):
        Li = int(lengths[i])
        prop_log = np.concatenate([[0.0], pad[i, : Li - 1]])
        prop = np.exp(prop_log)
        w = np.exp(prop) / np.exp(prop).sum() * Li
        total += float(np.sum(pad[i, :Li] * w))
    return -total / len(targets)


if __name__ == "__main__":
    key = jax.random.PRNGKey(0)
    k1, k2 = jax.random.split(key)

    B, C = 4, 32
    lengths = np.array([8, 6, 5, 3], dtype=np.int32)          # sorted descending
    L_max = int(lengths[0])

    padded_scores = jax.random.normal(k1, (B, L_max, C), dtype=jnp.float32)
    packed_np, batch_sizes = pack_padded(np.asarray(padded_scores), lengths)
    T = packed_np.shape[0]                                    # total packed steps
    targets = jax.random.randint(k2, (T,), 0, C, dtype=jnp.int32)

    loss = cross_entropy_loss_mul(jnp.asarray(packed_np), targets,
                                  batch_sizes, lengths)
    loss = jax.block_until_ready(loss)

    ref = reference_loss(np.asarray(packed_np), np.asarray(targets),
                         batch_sizes, lengths)
    assert np.allclose(float(loss), ref, rtol=2e-3, atol=2e-5), (float(loss), ref)
    print("KERNEL_OK")
</pallas_src>

<mosaic_0001>
module attributes {stable_mosaic.version = 11 : i64} {
  func.func @_logp_gather_kernel(%arg0: i32, %arg1: memref<24x32xf32, #tpu.memory_space<vmem>>, %arg2: memref<24x1xi32, #tpu.memory_space<vmem>>, %arg3: memref<24x1xf32, #tpu.memory_space<vmem>>) attributes {dimension_semantics = [#tpu.dimension_semantics<parallel>], iteration_bounds = array<i64: 1>, scalar_prefetch = 0 : i64, scratch_operands = 0 : i64, tpu.core_type = #tpu.core_type<tc>, window_params = [{transform_indices = @transform_0, window_bounds = array<i64: 24, 32>}, {transform_indices = @transform_1, window_bounds = array<i64: 24, 1>}, {transform_indices = @transform_2, window_bounds = array<i64: 24, 1>}]} {
    %c0 = arith.constant 0 : index
    %c0_0 = arith.constant 0 : index
    %0 = vector.load %arg1[%c0, %c0_0] : memref<24x32xf32, #tpu.memory_space<vmem>>, vector<24x32xf32>
    %c0_1 = arith.constant 0 : index
    %c0_2 = arith.constant 0 : index
    %1 = vector.load %arg2[%c0_1, %c0_2] : memref<24x1xi32, #tpu.memory_space<vmem>>, vector<24x1xi32>
    %cst = arith.constant dense<0xFF800000> : vector<24xf32>
    %2 = vector.multi_reduction <maximumf>, %0, %cst [1] : vector<24x32xf32> to vector<24xf32>
    %3 = vector.shape_cast %2 : vector<24xf32> to vector<24x1xf32>
    %4 = vector.broadcast %3 : vector<24x1xf32> to vector<24x32xf32>
    %5 = arith.subf %0, %4 : vector<24x32xf32>
    %6 = math.exp %5 : vector<24x32xf32>
    %cst_3 = arith.constant dense<0.000000e+00> : vector<24xf32>
    %7 = vector.multi_reduction <add>, %6, %cst_3 [1] : vector<24x32xf32> to vector<24xf32>
    %8 = vector.shape_cast %7 : vector<24xf32> to vector<24x1xf32>
    %9 = math.log %8 : vector<24x1xf32>
    %10 = tpu.iota {dimensions = array<i32: 1>} : vector<24x32xi32>
    %11 = vector.broadcast %1 : vector<24x1xi32> to vector<24x32xi32>
    %12 = arith.cmpi eq, %10, %11 : vector<24x32xi32>
    %cst_4 = arith.constant 0.000000e+00 : f32
    %13 = vector.broadcast %cst_4 : f32 to vector<24x32xf32>
    %14 = arith.select %12, %0, %13 : vector<24x32xi1>, vector<24x32xf32>
    %cst_5 = arith.constant dense<0.000000e+00> : vector<24xf32>
    %15 = vector.multi_reduction <add>, %14, %cst_5 [1] : vector<24x32xf32> to vector<24xf32>
    %16 = vector.shape_cast %15 : vector<24xf32> to vector<24x1xf32>
    %17 = arith.subf %16, %3 : vector<24x1xf32>
    %18 = arith.subf %17, %9 : vector<24x1xf32>
    %c0_6 = arith.constant 0 : index
    %c0_7 = arith.constant 0 : index
    %19 = vector.load %arg3[%c0_6, %c0_7] : memref<24x1xf32, #tpu.memory_space<vmem>>, vector<24x1xf32>
    tpu.vector_store %arg3[%c0_6, %c0_7], %18 {strides = array<i32>} : memref<24x1xf32, #tpu.memory_space<vmem>>, vector<24x1xf32>,
    return
  }
  func.func @transform_0(%arg0: i32) -> (i32, i32) {
    %c0_i32 = arith.constant 0 : i32
    %c0_i32_0 = arith.constant 0 : i32
    return %arg0, %c0_i32 : i32, i32
  }
  func.func @transform_1(%arg0: i32) -> (i32, i32) {
    %c0_i32 = arith.constant 0 : i32
    %c0_i32_0 = arith.constant 0 : i32
    return %arg0, %c0_i32 : i32, i32
  }
  func.func @transform_2(%arg0: i32) -> (i32, i32) {
    %c0_i32 = arith.constant 0 : i32
    %c0_i32_0 = arith.constant 0 : i32
    return %arg0, %c0_i32 : i32, i32
  }
}

</mosaic_0001>

<bundles_post_ra>
// kernel: tpu_custom_call.1
= control target key start
LH: loop header
LB: loop body
LE: loop exit
PB: predicated region body
PF: predicated region fallthrough
CT: control target
= control target key end

     0   :  { %vm17_vm0 = vcmask 261120   ;;  %v106_v3 = vmov 0   ;;  %v51_v19 = vlaneseq  ;;  %vm83_vm4 = vcmask 7168   ;;  %s158_s0 = inlined_call_operand.vmem [shape: f32[24,32], index: 0, kind: input, shape index: {}]   ;;  %s159_s1 = inlined_call_operand.vmem [shape: s32[24,1], index: 1, kind: input, shape index: {}]   ;;  %s160_s2 = inlined_call_operand.vmem [shape: f32[24,1], index: 2, kind: output, shape index: {}]  }
   0x1   :  { %v11_v0 = vld [vmem:[%s158_s0] sm:$0xff]  ;;  %v13_v1 = vld [vmem:[%s158_s0 + $0x10] sm:$0xff]  ;;  %v12_v2 = vld [vmem:[%s158_s0 + $0x8] sm:$0xff]  ;;  %92 = vset.pattern.permute.xlu1 %v106_v3  ;;  %93 = vset.pattern.permute.xlu0 %v106_v3 }
   0x2   :  { %v18_v4 = vsel %vm17_vm0, %v11_v0, -inf  ;;  %v24_v5 = vsel %vm17_vm0, %v13_v1, -inf  ;;  %v21_v6 = vsel %vm17_vm0, %v12_v2, -inf  ;;  %v14_v7 = vld [vmem:[%s159_s1] sm:$0xff]  ;;  %v16_v8 = vld [vmem:[%s159_s1 + $0x10] sm:$0xff]  ;;  %v15_v9 = vld [vmem:[%s159_s1 + $0x8] sm:$0xff] }
   0x3   :  { %19 = vmax.xlane.f32.xlu0 %v18_v4  ;;  %25 = vmax.xlane.f32.xlu1 %v24_v5  ;;  %v52_v20 = vand.u32 127, %v51_v19 }
   0x7   :  { %22 = vmax.xlane.f32.xlu0 %v21_v6 }
  0x14   :  { %54 = vperm.xlu1 %92, %v14_v7  }
  0x18   :  { %60 = vperm.xlu1 %92, %v16_v8  }
  0x1d   :  { %57 = vperm.xlu0 %93, %v15_v9  }
  0x90   :  { %v20_v10 = vpop.xlane.xlu0 %19  ;;  %v26_v11 = vpop.xlane.xlu1 %25 }
  0x91   :  { %v27_v12 = vsub.f32 %v11_v0, %v20_v10  ;;  %v29_v13 = vsub.f32 %v13_v1, %v26_v11 }
  0x93   :  { %v30_v14 = vmul.f32 1.442695, %v27_v12  ;;  %v34_v15 = vmul.f32 1.442695, %v29_v13 }
  0x94   :  { %v23_v16 = vpop.xlane.xlu0 %22  ;;  %v55_v22 = vpop.permute.xlu1 %54 }
  0x95   :  { %94 = vpow2.f32 %v30_v14  ;;  %v28_v17 = vsub.f32 %v12_v2, %v23_v16  ;;  %vm62_vm1 = vcmp.eq.s32.totalorder %v52_v20, %v55_v22 }
  0x96   :  { %96 = vpow2.f32 %v34_v15  ;;  %v65_v28 = vsel %vm62_vm1, %v11_v0, 0.0 }
  0x97   :  { %v32_v18 = vmul.f32 1.442695, %v28_v17  ;;  %v68_v30 = vsel %vm17_vm0, %v65_v28, 0.0 }
  0x98   :  { %v61_v31 = vpop.permute.xlu1 %60 }
  0x99   :  { %98 = vpow2.f32 %v32_v18  ;;  %vm64_vm3 = vcmp.eq.s32.totalorder %v52_v20, %v61_v31 }
  0x9a   :  { %v67_v34 = vsel %vm64_vm3, %v13_v1, 0.0 }
  0x9b   :  { %v74_v35 = vsel %vm17_vm0, %v67_v34, 0.0 }
  0x9c   :  { %v58_v25 = vpop.permute.xlu0 %57 }
  0x9d   :  { %vm63_vm2 = vcmp.eq.s32.totalorder %v52_v20, %v58_v25 }
  0x9e   :  { %v66_v32 = vsel %vm63_vm2, %v12_v2, 0.0 }
  0x9f   :  { %v95_v21 = vpop.eup %94  ;;  %v71_v33 = vsel %vm17_vm0, %v66_v32, 0.0 }
  0xa0   :  { %v97_v23 = vpop.eup %96  ;;  %v36_v24 = vsel %vm17_vm0, %v95_v21, 0.0 }
  0xa1   :  { %37 = vadd.xlane.f32.xlu1 %v36_v24  ;;  %v42_v26 = vsel %vm17_vm0, %v97_v23, 0.0 }
  0xa3   :  { %v99_v27 = vpop.eup %98 }
  0xa4   :  { %v39_v29 = vsel %vm17_vm0, %v99_v27, 0.0 }
  0xa5   :  { %43 = vadd.xlane.f32.xlu1 %v42_v26  ;;  %40 = vadd.xlane.f32.xlu0 %v39_v29 }
  0xa9   :  { %69 = vadd.xlane.f32.xlu1 %v68_v30 }
  0xad   :  { %72 = vadd.xlane.f32.xlu1 %v71_v33 }
  0xb1   :  { %75 = vadd.xlane.f32.xlu1 %v74_v35 }
 0x12e   :  { %v38_v36 = vpop.xlane.xlu1 %37 }
 0x12f   :  { %100 = vlog2.f32 %v38_v36 }
 0x132   :  { %v44_v37 = vpop.xlane.xlu1 %43  ;;  %v41_v38 = vpop.xlane.xlu0 %40 }
 0x133   :  { %102 = vlog2.f32 %v44_v37 }
 0x134   :  { %104 = vlog2.f32 %v41_v38 }
 0x136   :  { %v70_v39 = vpop.xlane.xlu1 %69 }
 0x137   :  { %v77_v42 = vsub.f32 %v70_v39, %v20_v10 }
 0x139   :  { %v101_v40 = vpop.eup %100 }
 0x13a   :  { %v46_v41 = vmul.f32 0.6931472, %v101_v40  ;;  %v73_v43 = vpop.xlane.xlu1 %72 }
 0x13b   :  { %v78_v50 = vsub.f32 %v73_v43, %v23_v16 }
 0x13c   :  { %v80_v44 = vsub.f32 %v77_v42, %v46_v41 }
 0x13d   :  { %v103_v45 = vpop.eup %102 }
 0x13e   :  { %v105_v46 = vpop.eup %104  ;;  %v50_v47 = vmul.f32 0.6931472, %v103_v45  ;;  %84 = vst.msk [vmem:[%s160_s2] sm:$0xff] %vm83_vm4, %v80_v44  ;;  %v76_v48 = vpop.xlane.xlu1 %75 }
 0x13f   :  { %v48_v49 = vmul.f32 0.6931472, %v105_v46  ;;  %v79_v51 = vsub.f32 %v76_v48, %v26_v11 }
 0x141   :  { %v81_v52 = vsub.f32 %v78_v50, %v48_v49  ;;  %v82_v53 = vsub.f32 %v79_v51, %v50_v47 }
 0x143   :  { %85 = vst.msk [vmem:[%s160_s2 + $0x8] sm:$0xff] %vm83_vm4, %v81_v52  ;;  %86 = vst.msk [vmem:[%s160_s2 + $0x10] sm:$0xff] %vm83_vm4, %v82_v53 }

</bundles_post_ra>
